<compile_context>
chip_gen: v7x
topology: tpu7x:2x2x1
jax: 0.10.0
libtpu: 0.0.40
codegen_flags: <defaults>
</compile_context>

<pallas_src>
import functools

import jax
import jax.numpy as jnp
from jax.experimental import pallas as pl
from jax.experimental.pallas import tpu as pltpu


def _round_up(x, m):
    return (x + m - 1) // m * m


def _flipout_kernel(x_ref, wmu_ref, wls_ref, weps_ref, b_ref, o_ref, w_scratch,
                    *, cache_weight):
    # Grid = (out_tiles, batch_tiles). Weight block index depends only on the out axis.
    def _sample_weight():
        # bf16 streams -> f32 sampling (VPU + EUP) -> bf16 MXU operand.
        w = (wmu_ref[...].astype(jnp.float32)
             + jnp.exp(wls_ref[...].astype(jnp.float32))
             * weps_ref[...].astype(jnp.float32))
        w_scratch[...] = w.astype(jnp.bfloat16)

    if cache_weight:
        # Sample once per out-tile (batch axis is sequential / "arbitrary"), reuse across
        # all batch tiles of this out-tile.
        @pl.when(pl.program_id(1) == 0)
        def _():
            _sample_weight()
    else:
        # Single out-tile (or single batch tile): no cross-iteration state, both grid axes
        # may be "parallel" (v7x megacore can split the batch axis).
        _sample_weight()

    # Weights are already (K, N): feed the MXU directly, bf16 operands, f32 accumulation.
    y = jnp.dot(x_ref[...], w_scratch[...], preferred_element_type=jnp.float32)  # (TM, TN) f32
    o_ref[...] = (y + b_ref[...]).astype(o_ref.dtype)


def flipout_linear(x, weight_mu_t, weight_logsigma_t, weight_eps_t,
                   bias_mu, bias_logsigma, bias_eps):
    """Reparameterized linear layer: y = x @ (mu + exp(ls) * eps) + (bmu + exp(bls) * beps).

    x:         (B, in_features)                      float32
    weight_*_t:(in_features, out_features)           float32  (canonical pre-transposed layout;
                                                      == PyTorch (out,in) param transposed once
                                                      at load time, NOT per call)
    bias_*:    (out_features,)                        float32
    returns:   (B, out_features)                      float32
    """
    B, K = x.shape
    N = weight_mu_t.shape[1]

    # ---- tile sizes & padding -------------------------------------------------------------
    # bf16 x: sublane packing wants multiples of 16 on the second-minor dim.
    TM = min(_round_up(B, 16), 256)
    Kp = _round_up(K, 128)               # full contraction dim kept per tile (small MLP layers)
    # Bound per-tile VMEM (v7x: 64 MiB physical / 32 MiB default scoped; v5e: 16 MiB scoped).
    TN_cap = 256 if Kp <= 2048 else 128
    TN = min(_round_up(N, 128), TN_cap)
    Bp = _round_up(B, TM)
    Np = _round_up(N, TN)

    # ---- wrapper-side prep (cheap, O(B*K) and O(K*N) casts, O(N) bias sampling) ------------
    xp = jnp.pad(x, ((0, Bp - B), (0, Kp - K))).astype(jnp.bfloat16)

    # Padding logsigma with 0 and mu/eps with 0 keeps all padded weight entries exactly 0.
    def _prep_w(w_t):
        return jnp.pad(w_t, ((0, Kp - K), (0, Np - N))).astype(jnp.bfloat16)

    wmu_p = _prep_w(weight_mu_t)
    wls_p = _prep_w(weight_logsigma_t)
    weps_p = _prep_w(weight_eps_t)

    # Bias reparameterization hoisted out of the kernel (O(N), constant across batch tiles).
    b_sampled = bias_mu + jnp.exp(bias_logsigma) * bias_eps
    b_p = jnp.pad(b_sampled, (0, Np - N)).reshape(1, Np).astype(jnp.float32)

    out_tiles = Np // TN
    batch_tiles = Bp // TM
    grid = (out_tiles, batch_tiles)      # out axis outermost -> weight tile constant across
                                         # the inner batch loop (no re-DMA of weight tiles).

    cache_weight = (out_tiles >= 2) and (batch_tiles >= 2)
    if cache_weight:
        # out axis split across cores; batch axis sequential so the scratch init at j==0 is safe.
        dim_sem = ("parallel", "arbitrary")
    else:
        # No cross-iteration reuse needed -> let megacore split whichever axis has >1 tile.
        dim_sem = ("parallel", "parallel")

    kernel = functools.partial(_flipout_kernel, cache_weight=cache_weight)

    out = pl.pallas_call(
        kernel,
        out_shape=jax.ShapeDtypeStruct((Bp, Np), jnp.float32),
        grid_spec=pltpu.PrefetchScalarGridSpec(
            num_scalar_prefetch=0,
            grid=grid,
            in_specs=[
                pl.BlockSpec((TM, Kp), lambda i, j: (j, 0)),   # x (bf16): batch-tiled, full K
                pl.BlockSpec((Kp, TN), lambda i, j: (0, i)),   # weight_mu  (K,N) bf16
                pl.BlockSpec((Kp, TN), lambda i, j: (0, i)),   # weight_logsigma (K,N) bf16
                pl.BlockSpec((Kp, TN), lambda i, j: (0, i)),   # weight_eps (K,N) bf16
                pl.BlockSpec((1, TN), lambda i, j: (0, i)),    # sampled bias (f32)
            ],
            out_specs=pl.BlockSpec((TM, TN), lambda i, j: (j, i)),
            scratch_shapes=[pltpu.VMEM((Kp, TN), jnp.bfloat16)],   # sampled weight tile
        ),
        compiler_params=pltpu.CompilerParams(
            dimension_semantics=dim_sem,
            vmem_limit_bytes=32 * 1024 * 1024,
        ),
    )(xp, wmu_p, wls_p, weps_p, b_p)

    return out[:B, :N]


if __name__ == "__main__":
    key = jax.random.PRNGKey(0)
    k_x, k_wmu, k_bmu, k_weps, k_beps = jax.random.split(key, 5)

    # Small shapes consistent with the module (a 2-moons MLP layer).
    batch, in_features, out_features = 8, 32, 16

    x = jax.random.normal(k_x, (batch, in_features), dtype=jnp.float32)

    # Deterministic parameter init mirroring __init__:
    #   weight_mu ~ N(0, 0.9), weight_logsigma = -2.5, bias_mu ~ N(0, 0.9), bias_logsigma = -2.5
    weight_mu = 0.9 * jax.random.normal(k_wmu, (out_features, in_features), dtype=jnp.float32)
    weight_logsigma = jnp.full((out_features, in_features), -2.5, dtype=jnp.float32)
    bias_mu = 0.9 * jax.random.normal(k_bmu, (out_features,), dtype=jnp.float32)
    bias_logsigma = jnp.full((out_features,), -2.5, dtype=jnp.float32)

    # One-time conversion to the canonical (in_features, out_features) layout ("load time",
    # not per forward call). Epsilon is iid normal, so it can be drawn directly in (K, N).
    weight_mu_t = weight_mu.T
    weight_logsigma_t = weight_logsigma.T
    weight_eps_t = jax.random.normal(k_weps, (in_features, out_features), dtype=jnp.float32)
    bias_eps = jax.random.normal(k_beps, (out_features,), dtype=jnp.float32)

    y = flipout_linear(x, weight_mu_t, weight_logsigma_t, weight_eps_t,
                       bias_mu, bias_logsigma, bias_eps)
    y = jax.block_until_ready(y)
    assert y.shape == (batch, out_features)
    assert y.dtype == jnp.float32

    # References.
    b_ref = bias_mu + jnp.exp(bias_logsigma) * bias_eps
    w_ref_f32 = weight_mu_t + jnp.exp(weight_logsigma_t) * weight_eps_t        # (K, N)
    y_f32 = x @ w_ref_f32 + b_ref

    # bf16-stream / f32-sampling / bf16-MXU-operand reference (matches the kernel math).
    def _bf(v):
        return v.astype(jnp.bfloat16).astype(jnp.float32)
    w_ref_bf16 = (_bf(weight_mu_t)
                  + jnp.exp(_bf(weight_logsigma_t)) * _bf(weight_eps_t)).astype(jnp.bfloat16)
    y_bf16 = jnp.dot(x.astype(jnp.bfloat16), w_ref_bf16,
                     preferred_element_type=jnp.float32) + b_ref

    assert jnp.allclose(y, y_bf16, atol=1e-2, rtol=1e-2), "mismatch vs bf16-operand reference"
    assert jnp.allclose(y, y_f32, atol=5e-2, rtol=5e-2), "mismatch vs f32 reference"

    # TODO(synk): at true moons sizes (8x32->16) per-call overhead dominates; fusing the whole
    # sample->matmul->activation MLP into one pallas_call (or leaving it to XLA) is the real win.
    # TODO(synk): kl_divergence() is an analytic training-loss term (no tensor hot path); not kernelized.
    print("KERNEL_OK")
</pallas_src>

<mosaic_0001>
module attributes {stable_mosaic.version = 11 : i64} {
  func.func @_flipout_kernel(%arg0: i32, %arg1: i32, %arg2: memref<16x128xbf16, #tpu.memory_space<vmem>>, %arg3: memref<128x128xbf16, #tpu.memory_space<vmem>>, %arg4: memref<128x128xbf16, #tpu.memory_space<vmem>>, %arg5: memref<128x128xbf16, #tpu.memory_space<vmem>>, %arg6: memref<1x128xf32, #tpu.memory_space<vmem>>, %arg7: memref<16x128xf32, #tpu.memory_space<vmem>>, %arg8: memref<128x128xbf16, #tpu.memory_space<vmem>>) attributes {dimension_semantics = [#tpu.dimension_semantics<parallel>, #tpu.dimension_semantics<parallel>], iteration_bounds = array<i64: 1, 1>, scalar_prefetch = 0 : i64, scratch_operands = 1 : i64, tpu.core_type = #tpu.core_type<tc>, window_params = [{transform_indices = @transform_0, window_bounds = array<i64: 16, 128>}, {transform_indices = @transform_1, window_bounds = array<i64: 128, 128>}, {transform_indices = @transform_2, window_bounds = array<i64: 128, 128>}, {transform_indices = @transform_3, window_bounds = array<i64: 128, 128>}, {transform_indices = @transform_4, window_bounds = array<i64: 1, 128>}, {transform_indices = @transform_5, window_bounds = array<i64: 16, 128>}]} {
    %c0 = arith.constant 0 : index
    %c0_0 = arith.constant 0 : index
    %0 = vector.load %arg3[%c0, %c0_0] : memref<128x128xbf16, #tpu.memory_space<vmem>>, vector<128x128xbf16>
    %1 = arith.extf %0 : vector<128x128xbf16> to vector<128x128xf32>
    %c0_1 = arith.constant 0 : index
    %c0_2 = arith.constant 0 : index
    %2 = vector.load %arg4[%c0_1, %c0_2] : memref<128x128xbf16, #tpu.memory_space<vmem>>, vector<128x128xbf16>
    %3 = arith.extf %2 : vector<128x128xbf16> to vector<128x128xf32>
    %4 = math.exp %3 : vector<128x128xf32>
    %c0_3 = arith.constant 0 : index
    %c0_4 = arith.constant 0 : index
    %5 = vector.load %arg5[%c0_3, %c0_4] : memref<128x128xbf16, #tpu.memory_space<vmem>>, vector<128x128xbf16>
    %6 = arith.extf %5 : vector<128x128xbf16> to vector<128x128xf32>
    %7 = arith.mulf %4, %6 : vector<128x128xf32>
    %8 = arith.addf %1, %7 : vector<128x128xf32>
    %9 = arith.truncf %8 : vector<128x128xf32> to vector<128x128xbf16>
    %c0_5 = arith.constant 0 : index
    %c0_6 = arith.constant 0 : index
    %10 = vector.load %arg8[%c0_5, %c0_6] : memref<128x128xbf16, #tpu.memory_space<vmem>>, vector<128x128xbf16>
    tpu.vector_store %arg8[%c0_5, %c0_6], %9 {strides = array<i32>} : memref<128x128xbf16, #tpu.memory_space<vmem>>, vector<128x128xbf16>,
    %c0_7 = arith.constant 0 : index
    %c0_8 = arith.constant 0 : index
    %11 = vector.load %arg2[%c0_7, %c0_8] : memref<16x128xbf16, #tpu.memory_space<vmem>>, vector<16x128xbf16>
    %c0_9 = arith.constant 0 : index
    %c0_10 = arith.constant 0 : index
    %12 = vector.load %arg8[%c0_9, %c0_10] : memref<128x128xbf16, #tpu.memory_space<vmem>>, vector<128x128xbf16>
    %cst = arith.constant dense<0.000000e+00> : vector<16x128xf32>
    %13 = tpu.matmul %11, %12, %cst {dimension_numbers = #tpu.dot_dimension_numbers<[1], [0], [0], [1], [0, 0, 1, 1], [], []>} : vector<16x128xbf16>, vector<128x128xbf16>, vector<16x128xf32> -> vector<16x128xf32>
    %c0_11 = arith.constant 0 : index
    %c0_12 = arith.constant 0 : index
    %14 = vector.load %arg6[%c0_11, %c0_12] : memref<1x128xf32, #tpu.memory_space<vmem>>, vector<1x128xf32>
    %15 = vector.broadcast %14 : vector<1x128xf32> to vector<16x128xf32>
    %16 = arith.addf %13, %15 : vector<16x128xf32>
    %c0_13 = arith.constant 0 : index
    %c0_14 = arith.constant 0 : index
    %17 = vector.load %arg7[%c0_13, %c0_14] : memref<16x128xf32, #tpu.memory_space<vmem>>, vector<16x128xf32>
    tpu.vector_store %arg7[%c0_13, %c0_14], %16 {strides = array<i32>} : memref<16x128xf32, #tpu.memory_space<vmem>>, vector<16x128xf32>,
    return
  }
  func.func @transform_0(%arg0: i32, %arg1: i32) -> (i32, i32) {
    %c0_i32 = arith.constant 0 : i32
    %c0_i32_0 = arith.constant 0 : i32
    return %arg1, %c0_i32 : i32, i32
  }
  func.func @transform_1(%arg0: i32, %arg1: i32) -> (i32, i32) {
    %c0_i32 = arith.constant 0 : i32
    %c0_i32_0 = arith.constant 0 : i32
    return %c0_i32, %arg0 : i32, i32
  }
  func.func @transform_2(%arg0: i32, %arg1: i32) -> (i32, i32) {
    %c0_i32 = arith.constant 0 : i32
    %c0_i32_0 = arith.constant 0 : i32
    return %c0_i32, %arg0 : i32, i32
  }
  func.func @transform_3(%arg0: i32, %arg1: i32) -> (i32, i32) {
    %c0_i32 = arith.constant 0 : i32
    %c0_i32_0 = arith.constant 0 : i32
    return %c0_i32, %arg0 : i32, i32
  }
  func.func @transform_4(%arg0: i32, %arg1: i32) -> (i32, i32) {
    %c0_i32 = arith.constant 0 : i32
    %c0_i32_0 = arith.constant 0 : i32
    return %c0_i32, %arg0 : i32, i32
  }
  func.func @transform_5(%arg0: i32, %arg1: i32) -> (i32, i32) {
    %c0_i32 = arith.constant 0 : i32
    return %arg1, %arg0 : i32, i32
  }
}

</mosaic_0001>

<bundles_post_ra>
// kernel: tpu_custom_call.1
= control target key start
LH: loop header
LB: loop body
LE: loop exit
PB: predicated region body
PF: predicated region fallthrough
CT: control target
= control target key end

     0   :  { %10 = vsyncpa [#allocation4], 0  ;;  %s803_s0 = inlined_call_operand.hbm [shape: bf16[16,128], index: 0, kind: input, shape index: {}]   ;;  %s804_s1 = inlined_call_operand.hbm [shape: bf16[128,128], index: 1, kind: input, shape index: {}]   ;;  %s805_s2 = inlined_call_operand.hbm [shape: bf16[128,128], index: 2, kind: input, shape index: {}]   ;;  %s806_s3 = inlined_call_operand.hbm [shape: bf16[128,128], index: 3, kind: input, shape index: {}]   ;;  %s807_s4 = inlined_call_operand.vmem [shape: f32[1,128], index: 4, kind: input, shape index: {}]   ;;  %s808_s5 = inlined_call_operand.hbm [shape: f32[16,128], index: 5, kind: output, shape index: {}]  }
   0x1   :  { %11 = vsyncpa [#allocation7], 0 }
   0x2   :  { %12 = vsyncpa [#allocation10], 0 }
   0x3   :  { %13 = vsyncpa [#allocation5], 0  ;;  %s648_s18 = smov [#allocation6]   ;;  %s649_s20 = smov [#allocation3]  }
   0x4   :  { %s31_s19 = sshll.u32 %s648_s18, 4  ;;  %s19_s21 = sshll.u32 %s649_s20, 4  ;;  %s32_s19 = int_to_ptr.vmem [resolvable:$true] %s31_s19  ;;  %s689_s21 = int_to_ptr.vmem [resolvable:$true] %s19_s21 }
   0x5   :  { %s530_s24 = scalar_lea.hbm %s804_s1, 1024 }
   0x6   :  { %p531_p0 = scmp.ne.s32.totalorder %s804_s1, %s530_s24  ;;  %p534_p1 = scmp.lt.u32.totalorder %s530_s24, %s804_s1 }
   0x8   :  { %p536_p2 = pnand %p534_p1, %p531_p0 }
   0xa   :  { %539 = shalt.err (!%p536_p2)
}
   0xb   :  { %s540_s29 = scalar_lea.vmem %s32_s19, 1024  ;;  %p545_p4 = scmp.lt.s32.totalorder %s32_s19, %s32_s19 }
   0xc   :  { %p541_p3 = scmp.ne.s32.totalorder %s32_s19, %s540_s29  ;;  %p546_p5 = scmp.lt.s32.totalorder %s540_s29, %s540_s29 }
   0xe   :  { %p547_p6 = por %p546_p5, %p545_p4 }
  0x10   :  { %p548_p7 = pnand %p547_p6, %p541_p3 }
  0x12   :  { %551 = shalt.err (!%p548_p7)
}
  0x13   :  { %s650_s30 = smov 64   ;;  %s651_s6 = smov 4  }
  0x14   :  { %37 = dma.hbm_to_vmem [thread:$0]  %s804_s1, 1024, %s32_s19, [#allocation7], %s650_s30, %s650_s30, %s651_s6  }
  0x15   :  { %s552_s11 = scalar_lea.hbm %s803_s0, 128 }
  0x16   :  { %p553_p8 = scmp.ne.s32.totalorder %s803_s0, %s552_s11  ;;  %p556_p9 = scmp.lt.u32.totalorder %s552_s11, %s803_s0 }
  0x18   :  { %p558_p10 = pnand %p556_p9, %p553_p8 }
  0x1a   :  { %561 = shalt.err (!%p558_p10)
}
  0x1b   :  { %s562_s16 = scalar_lea.vmem %s689_s21, 128  ;;  %p567_p12 = scmp.lt.s32.totalorder %s689_s21, %s689_s21 }
  0x1c   :  { %p563_p11 = scmp.ne.s32.totalorder %s689_s21, %s562_s16  ;;  %p568_p13 = scmp.lt.s32.totalorder %s562_s16, %s562_s16 }
  0x1e   :  { %p569_p0 = por %p568_p13, %p567_p12 }
  0x20   :  { %p570_p1 = pnand %p569_p0, %p563_p11 }
  0x22   :  { %573 = shalt.err (!%p570_p1)
}
  0x23   :  { %25 = dma.hbm_to_vmem [thread:$0]  %s803_s0, 128, %s689_s21, [#allocation4], %s650_s30, %s650_s30, %s651_s6  }
  0x24   :  { %s652_s18 = smov [#allocation8]   ;;  %s653_s20 = smov [#allocation9]  }
  0x25   :  { %s43_s19 = sshll.u32 %s652_s18, 4  ;;  %s55_s22 = sshll.u32 %s653_s20, 4  ;;  %s44_s19 = int_to_ptr.vmem [resolvable:$true] %s43_s19  ;;  %s726_s22 = int_to_ptr.vmem [resolvable:$true] %s55_s22 }
  0x26   :  { %s574_s25 = scalar_lea.hbm %s805_s2, 1024 }
  0x27   :  { %p575_p2 = scmp.ne.s32.totalorder %s805_s2, %s574_s25  ;;  %p578_p3 = scmp.lt.u32.totalorder %s574_s25, %s805_s2 }
  0x29   :  { %p580_p4 = pnand %p578_p3, %p575_p2 }
  0x2b   :  { %583 = shalt.err (!%p580_p4)
}
  0x2c   :  { %s584_s0 = scalar_lea.vmem %s44_s19, 1024  ;;  %p589_p6 = scmp.lt.s32.totalorder %s44_s19, %s44_s19 }
  0x2d   :  { %p585_p5 = scmp.ne.s32.totalorder %s44_s19, %s584_s0  ;;  %p590_p7 = scmp.lt.s32.totalorder %s584_s0, %s584_s0 }
  0x2f   :  { %p591_p8 = por %p590_p7, %p589_p6 }
  0x31   :  { %p592_p9 = pnand %p591_p8, %p585_p5 }
  0x33   :  { %595 = shalt.err (!%p592_p9)
}
  0x34   :  { %49 = dma.hbm_to_vmem [thread:$0]  %s805_s2, 1024, %s44_s19, [#allocation7], %s650_s30, %s650_s30, %s651_s6  }
  0x35   :  { %s596_s10 = scalar_lea.hbm %s806_s3, 1024 }
  0x36   :  { %p597_p10 = scmp.ne.s32.totalorder %s806_s3, %s596_s10  ;;  %p600_p11 = scmp.lt.u32.totalorder %s596_s10, %s806_s3 }
  0x38   :  { %p602_p12 = pnand %p600_p11, %p597_p10 }
  0x3a   :  { %605 = shalt.err (!%p602_p12)
}
  0x3b   :  { %s606_s15 = scalar_lea.vmem %s726_s22, 1024  ;;  %p611_p0 = scmp.lt.s32.totalorder %s726_s22, %s726_s22 }
  0x3c   :  { %p607_p13 = scmp.ne.s32.totalorder %s726_s22, %s606_s15  ;;  %p612_p1 = scmp.lt.s32.totalorder %s606_s15, %s606_s15 }
  0x3e   :  { %p613_p2 = por %p612_p1, %p611_p0 }
  0x40   :  { %p614_p3 = pnand %p613_p2, %p607_p13 }
  0x42   :  { %617 = shalt.err (!%p614_p3)
}
  0x43   :  { %61 = dma.hbm_to_vmem [thread:$0]  %s806_s3, 1024, %s726_s22, [#allocation10], %s650_s30, %s650_s30, %s651_s6  }
  0x44   :  { %640 = dma.done.wait [#allocation4], 128  }
  0x45   :  { %641 = vsyncadd [#allocation4], 4294967168 }
  0x46   :  { %642 = dma.done.wait [#allocation7], 2048  }
  0x47   :  { %643 = vsyncadd [#allocation7], 4294965248 }
  0x48   :  { %644 = dma.done.wait [#allocation10], 1024  }
  0x49   :  { %645 = vsyncadd [#allocation10], 4294966272  ;;  %v654_v0 = vmov 0.0   ;;  %vm655_vm0 = vmmov 0   ;;  %v373_v1 = vld [vmem:[#allocation8] sm:$0xff]   ;;  %v443_v4 = vld [vmem:[#allocation8 + $0x8] sm:$0xff]  }
  0x4a   :  { %466 = vmatprep.subr.bf16.mxu0 %v654_v0  ;;  %482 = vmatprep.mubr.msk.bf16.mxu0 %vm655_vm0, %v654_v0  ;;  %v374_v2 = vunpack.c.l.bf16 %v373_v1  ;;  %v375_v3 = vunpack.c.h.bf16 %v373_v1  ;;  %v444_v5 = vld [vmem:[#allocation8 + $0x10] sm:$0xff]   ;;  %v378_v8 = vunpack.c.l.bf16 %v443_v4  ;;  %v379_v9 = vunpack.c.h.bf16 %v443_v4  ;;  %v445_v13 = vld [vmem:[#allocation8 + $0x18] sm:$0xff]   ;;  %v765_v14 = vld [vmem:[#allocation6] sm:$0xff]   ;;  %s656_s6 = smov [#allocation11]  }
  0x4b   :  { %v382_v12 = vunpack.c.l.bf16 %v444_v5  ;;  %v405_v15 = vld [vmem:[#allocation9] sm:$0xff]   ;;  %v383_v16 = vunpack.c.h.bf16 %v444_v5  ;;  %v767_v18 = vld [vmem:[#allocation6 + $0x8] sm:$0xff]   ;;  %v386_v20 = vunpack.c.l.bf16 %v445_v13  ;;  %v387_v21 = vunpack.c.h.bf16 %v445_v13  ;;  %v773_v33 = vld [vmem:[#allocation6 + $0x10] sm:$0xff]   ;;  %s324_s1 = sshll.u32 %s656_s6, 4  ;;  %s325_s1 = int_to_ptr.vmem [resolvable:$true] %s324_s1 }
  0x4c   :  { %v141_v6 = vmul.f32 1.442695, %v374_v2  ;;  %v143_v7 = vmul.f32 1.442695, %v375_v3  ;;  %v145_v10 = vmul.f32 1.442695, %v378_v8  ;;  %v342_v23 = vunpack.c.l.bf16 %v765_v14  ;;  %p623_p5 = scmp.lt.s32.totalorder %s325_s1, %s325_s1 }
  0x4d   :  { %v147_v11 = vmul.f32 1.442695, %v379_v9  ;;  %v149_v17 = vmul.f32 1.442695, %v382_v12  ;;  %v151_v19 = vmul.f32 1.442695, %v383_v16  ;;  %v343_v24 = vunpack.c.h.bf16 %v765_v14 }
  0x4e   :  { %498 = vpow2.f32 %v141_v6  ;;  %v446_v22 = vld [vmem:[#allocation8 + $0x20] sm:$0xff]   ;;  %v406_v25 = vunpack.c.l.bf16 %v405_v15  ;;  %v450_v26 = vld [vmem:[#allocation9 + $0x8] sm:$0xff]   ;;  %v407_v28 = vunpack.c.h.bf16 %v405_v15  ;;  %v153_v29 = vmul.f32 1.442695, %v386_v20  ;;  %v451_v34 = vld [vmem:[#allocation9 + $0x10] sm:$0xff]   ;;  %s618_s17 = scalar_lea.vmem %s325_s1, 256 }
  0x4f   :  { %500 = vpow2.f32 %v143_v7  ;;  %v447_v27 = vld [vmem:[#allocation8 + $0x28] sm:$0xff]   ;;  %v155_v30 = vmul.f32 1.442695, %v387_v21  ;;  %v346_v31 = vunpack.c.l.bf16 %v767_v18  ;;  %v347_v32 = vunpack.c.h.bf16 %v767_v18  ;;  %v448_v40 = vld [vmem:[#allocation8 + $0x30] sm:$0xff]   ;;  %v775_v41 = vld [vmem:[#allocation6 + $0x18] sm:$0xff]   ;;  %p619_p4 = scmp.ne.s32.totalorder %s325_s1, %s618_s17  ;;  %p624_p6 = scmp.lt.s32.totalorder %s618_s17, %s618_s17 }
  0x50   :  { %502 = vpow2.f32 %v145_v10  ;;  %v390_v35 = vunpack.c.l.bf16 %v446_v22  ;;  %v391_v36 = vunpack.c.h.bf16 %v446_v22  ;;  %v410_v37 = vunpack.c.l.bf16 %v450_v26  ;;  %v452_v56 = vld [vmem:[#allocation9 + $0x18] sm:$0xff]   ;;  %v453_v61 = vld [vmem:[#allocation9 + $0x20] sm:$0xff]  }
  0x51   :  { %504 = vpow2.f32 %v147_v11  ;;  %v411_v38 = vunpack.c.h.bf16 %v450_v26  ;;  %v394_v39 = vunpack.c.l.bf16 %v447_v27  ;;  %v395_v44 = vunpack.c.h.bf16 %v447_v27  ;;  %v449_v4 = vld [vmem:[#allocation8 + $0x38] sm:$0xff]   ;;  %v439_v20 = vld [vmem:[#allocation6 + $0x20] sm:$0xff]   ;;  %v454_v27 = vld [vmem:[#allocation9 + $0x28] sm:$0xff]   ;;  %p625_p7 = por %p624_p6, %p623_p5 }
  0x52   :  { %506 = vpow2.f32 %v149_v17  ;;  %v157_v42 = vmul.f32 1.442695, %v390_v35  ;;  %v159_v43 = vmul.f32 1.442695, %v391_v36  ;;  %v350_v45 = vunpack.c.l.bf16 %v773_v33 }
  0x53   :  { %508 = vpow2.f32 %v151_v19  ;;  %v351_v46 = vunpack.c.h.bf16 %v773_v33  ;;  %v414_v47 = vunpack.c.l.bf16 %v451_v34  ;;  %v161_v48 = vmul.f32 1.442695, %v394_v39  ;;  %p626_p8 = pnand %p625_p7, %p619_p4 }
  0x54   :  { %510 = vpow2.f32 %v153_v29  ;;  %v415_v50 = vunpack.c.h.bf16 %v451_v34  ;;  %v163_v51 = vmul.f32 1.442695, %v395_v44  ;;  %v398_v52 = vunpack.c.l.bf16 %v448_v40  ;;  %v455_v44 = vld [vmem:[#allocation9 + $0x30] sm:$0xff]  }
  0x55   :  { %512 = vpow2.f32 %v155_v30  ;;  %v354_v55 = vunpack.c.l.bf16 %v775_v41  ;;  %v399_v57 = vunpack.c.h.bf16 %v448_v40  ;;  %v355_v60 = vunpack.c.h.bf16 %v775_v41 }
  0x56   :  { %514 = vpow2.f32 %v157_v42  ;;  %v165_v62 = vmul.f32 1.442695, %v398_v52  ;;  %v418_v8 = vunpack.c.l.bf16 %v452_v56  ;;  %v419_v9 = vunpack.c.h.bf16 %v452_v56 }
  0x57   :  { %516 = vpow2.f32 %v159_v43  ;;  %v167_v3 = vmul.f32 1.442695, %v399_v57  ;;  %v422_v13 = vunpack.c.l.bf16 %v453_v61  ;;  %v402_v17 = vunpack.c.l.bf16 %v449_v4  ;;  %v456_v57 = vld [vmem:[#allocation9 + $0x38] sm:$0xff]  }
  0x58   :  { %v499_v49 = vpop.eup %498  ;;  %518 = vpow2.f32 %v161_v48  ;;  %v423_v21 = vunpack.c.h.bf16 %v453_v61  ;;  %v403_v22 = vunpack.c.h.bf16 %v449_v4  ;;  %v359_v33 = vunpack.c.h.bf16 %v439_v20 }
  0x59   :  { %v501_v53 = vpop.eup %500  ;;  %v205_v54 = vmul.f32 %v499_v49, %v406_v25  ;;  %520 = vpow2.f32 %v163_v51  ;;  %v427_v43 = vunpack.c.h.bf16 %v454_v27  ;;  %v430_v51 = vunpack.c.l.bf16 %v455_v44 }
  0x5a   :  { %v503_v58 = vpop.eup %502  ;;  %v206_v59 = vmul.f32 %v501_v53, %v407_v28  ;;  %522 = vpow2.f32 %v165_v62  ;;  %v169_v28 = vmul.f32 1.442695, %v402_v17  ;;  %v171_v30 = vmul.f32 1.442695, %v403_v22 }
  0x5b   :  { %v505_v63 = vpop.eup %504  ;;  %v221_v1 = vadd.f32 %v342_v23, %v205_v54  ;;  %v207_v2 = vmul.f32 %v503_v58, %v410_v37  ;;  %524 = vpow2.f32 %v167_v3  ;;  %v440_v37 = vld [vmem:[#allocation6 + $0x28] sm:$0xff]   ;;  %v431_v52 = vunpack.c.h.bf16 %v455_v44 }
  0x5c   :  { %v507_v5 = vpop.eup %506  ;;  %v222_v6 = vadd.f32 %v343_v24, %v206_v59  ;;  %v208_v7 = vmul.f32 %v505_v63, %v411_v38  ;;  %526 = vpow2.f32 %v169_v28  ;;  %v426_v38 = vunpack.c.l.bf16 %v454_v27 }
  0x5d   :  { %v509_v10 = vpop.eup %508  ;;  %v223_v11 = vadd.f32 %v346_v31, %v207_v2  ;;  %v209_v12 = vmul.f32 %v507_v5, %v414_v47  ;;  %528 = vpow2.f32 %v171_v30  ;;  %v363_v49 = vunpack.c.h.bf16 %v440_v37 }
  0x5e   :  { %v237_v14 = vpack.c.bf16 %v222_v6, %v221_v1  ;;  %v224_v15 = vadd.f32 %v347_v32, %v208_v7  ;;  %v210_v16 = vmul.f32 %v509_v10, %v415_v50  ;;  %v511_v18 = vpop.eup %510  ;;  %v358_v32 = vunpack.c.l.bf16 %v439_v20  ;;  %v441_v50 = vld [vmem:[#allocation6 + $0x30] sm:$0xff]   ;;  %v442_v6 = vld [vmem:[#allocation6 + $0x38] sm:$0xff]  }
  0x5f   :  { %v225_v19 = vadd.f32 %v350_v45, %v209_v12  ;;  %v513_v23 = vpop.eup %512  ;;  %v211_v26 = vmul.f32 %v511_v18, %v418_v8  ;;  %v366_v59 = vunpack.c.l.bf16 %v441_v50  ;;  %v434_v62 = vunpack.c.l.bf16 %v456_v57  ;;  %v338_v20 = vld [vmem:[%s807_s4] ss:$0 sm:$0xff] }
  0x60   :  { %467 = vmatpush3.bf16.msra.mxu0 %v237_v14  ;;  %v238_v24 = vpack.c.bf16 %v224_v15, %v223_v11  ;;  %v226_v25 = vadd.f32 %v351_v46, %v210_v16  ;;  %v212_v29 = vmul.f32 %v513_v23, %v419_v9  ;;  %v515_v31 = vpop.eup %514  ;;  %v362_v46 = vunpack.c.l.bf16 %v440_v37 }
  0x61   :  { %468 = vmatprep.subr.bf16.mxu0 %v654_v0  ;;  %v517_v34 = vpop.eup %516  ;;  %v227_v35 = vadd.f32 %v354_v55, %v211_v26  ;;  %v213_v41 = vmul.f32 %v515_v31, %v422_v13  ;;  %v435_v63 = vunpack.c.h.bf16 %v456_v57  ;;  %v370_v9 = vunpack.c.l.bf16 %v442_v6 }
  0x62   :  { %v228_v36 = vadd.f32 %v355_v60, %v212_v29  ;;  %v519_v39 = vpop.eup %518  ;;  %v239_v40 = vpack.c.bf16 %v226_v25, %v225_v19  ;;  %v214_v42 = vmul.f32 %v517_v34, %v423_v21  ;;  %v367_v60 = vunpack.c.h.bf16 %v441_v50  ;;  %v497_v19 = vld [vmem:[#allocation3] sm:$0xff]  }
  0x63   :  { %v521_v45 = vpop.eup %520  ;;  %v229_v53 = vadd.f32 %v358_v32, %v213_v41  ;;  %v215_v55 = vmul.f32 %v519_v39, %v426_v38  ;;  %v371_v10 = vunpack.c.h.bf16 %v442_v6 }
  0x64   :  { %469 = vmatpush3.bf16.msra.mxu0 %v238_v24  ;;  %v523_v47 = vpop.eup %522  ;;  %v240_v48 = vpack.c.bf16 %v228_v36, %v227_v35  ;;  %v230_v54 = vadd.f32 %v359_v33, %v214_v42  ;;  %v216_v56 = vmul.f32 %v521_v45, %v427_v43 }
  0x65   :  { %470 = vmatprep.subr.bf16.mxu0 %v654_v0  ;;  %v525_v58 = vpop.eup %524  ;;  %v217_v61 = vmul.f32 %v523_v47, %v430_v51  ;;  %v231_v3 = vadd.f32 %v362_v46, %v215_v55 }
  0x66   :  { %v527_v1 = vpop.eup %526  ;;  %v241_v2 = vpack.c.bf16 %v230_v54, %v229_v53  ;;  %v232_v4 = vadd.f32 %v363_v49, %v216_v56  ;;  %v218_v5 = vmul.f32 %v525_v58, %v431_v52 }
  0x67   :  { %v529_v7 = vpop.eup %528  ;;  %v233_v8 = vadd.f32 %v366_v59, %v217_v61  ;;  %v219_v13 = vmul.f32 %v527_v1, %v434_v62 }
  0x68   :  { %471 = vmatpush3.bf16.msra.mxu0 %v239_v40  ;;  %v242_v11 = vpack.c.bf16 %v232_v4, %v231_v3  ;;  %v234_v12 = vadd.f32 %v367_v60, %v218_v5  ;;  %v220_v14 = vmul.f32 %v529_v7, %v435_v63 }
  0x69   :  { %472 = vmatprep.subr.bf16.mxu0 %v654_v0  ;;  %v235_v16 = vadd.f32 %v370_v9, %v219_v13 }
  0x6a   :  { %v243_v15 = vpack.c.bf16 %v234_v12, %v233_v8  ;;  %v236_v17 = vadd.f32 %v371_v10, %v220_v14 }
  0x6c   :  { %473 = vmatpush3.bf16.msra.mxu0 %v240_v48  ;;  %v244_v18 = vpack.c.bf16 %v236_v17, %v235_v16 }
  0x6d   :  { %474 = vmatprep.subr.bf16.mxu0 %v654_v0 }
  0x70   :  { %475 = vmatpush3.bf16.msra.mxu0 %v241_v2 }
  0x71   :  { %476 = vmatprep.subr.bf16.mxu0 %v654_v0 }
  0x74   :  { %477 = vmatpush3.bf16.msra.mxu0 %v242_v11 }
  0x75   :  { %478 = vmatprep.subr.bf16.mxu0 %v654_v0 }
  0x78   :  { %479 = vmatpush3.bf16.msra.mxu0 %v243_v15 }
  0x79   :  { %480 = vmatprep.subr.bf16.mxu0 %v654_v0 }
  0x7c   :  { %481 = vmatpush3.bf16.msra.mxu0 %v244_v18 }
  0x7f   :  { %483 = vmatmul.mubr.bf16.vlgmr.msra.gmra.mrb[0].mxu0 %v497_v19 }
 0x152   :  { %v310_v21 = vpop.f32.mrb[0].mxu0 }
 0x153   :  { %v311_v22 = vadd.f32 %v338_v20, %v310_v21  ;;  %v484_v23 = vpop.f32.mrb[1].mxu0 }
 0x154   :  { %v313_v24 = vpop.f32.mrb[2].mxu0 }
 0x155   :  { %317 = vst [vmem:[#allocation11] sm:$0xff] %v311_v22  ;;  %v314_v25 = vadd.f32 %v338_v20, %v313_v24  ;;  %v485_v26 = vpop.f32.mrb[3].mxu0 }
 0x157   :  { %318 = vst [vmem:[#allocation11 + $0x8] sm:$0xff] %v314_v25 }
 0x158   :  { %629 = shalt.err (!%p626_p8)
}
 0x159   :  { %s630_s19 = scalar_lea.hbm %s808_s5, 256 }
 0x15a   :  { %p631_p9 = scmp.ne.s32.totalorder %s808_s5, %s630_s19  ;;  %p634_p10 = scmp.lt.u32.totalorder %s630_s19, %s808_s5 }
 0x15c   :  { %p636_p11 = pnand %p634_p10, %p631_p9 }
 0x15e   :  { %639 = shalt.err (!%p636_p11)
}
 0x15f   :  { %s657_s25 = smov 128   ;;  %s658_s26 = smov 8  }
 0x160   :  { %330 = dma.vmem_to_hbm [thread:$0]  %s325_s1, 256, %s808_s5, [#allocation5], %s657_s25, %s657_s25, %s658_s26  }
 0x161   :  { %646 = dma.done.wait [#allocation5], 256  }
 0x162   :  { %647 = vsyncadd [#allocation5], 4294967040 }
 0x163   :  { %334 = vsyncpa [#allocation4], 1 }
 0x164   :  { %335 = vsyncpa [#allocation7], 1 }
 0x165   :  { %336 = vsyncpa [#allocation10], 1 }
 0x166   :  { %337 = vsyncpa [#allocation5], 1 }

</bundles_post_ra>
